<compile_context>
chip_gen: v5e
topology: v5e:2x2
jax: 0.10.0
libtpu: 0.0.40
codegen_flags: <defaults>
</compile_context>

<pallas_src>
import functools

import jax
import jax.numpy as jnp
from jax.experimental import pallas as pl
from jax.experimental.pallas import tpu as pltpu


def _pool2d_kernel(x_ref, o_ref, *, kernel_size, stride, out_h, out_w, mode):
    """One-shot 2-D pooling.

    x_ref: (B, H, W, C)  -- NHWC: lanes carry C (contiguous, never strided),
                            sublanes carry W, H/B are leading dims.
    o_ref: (B, out_h, out_w, C)
    """
    acc = None
    # Static k*k unroll over window offsets (k is tiny); each iteration is a
    # strided window load + one elementwise op -- no concat / relayout.
    for di in range(kernel_size):
        for dj in range(kernel_size):
            win = x_ref[:, pl.ds(di, out_h, stride=stride),
                           pl.ds(dj, out_w, stride=stride), :]
            if mode == "max":
                acc = win if acc is None else jnp.maximum(acc, win)
            else:  # "avg"
                win = win.astype(jnp.float32)
                acc = win if acc is None else acc + win
    if mode == "avg":
        acc = acc * (1.0 / float(kernel_size * kernel_size))
    o_ref[...] = acc.astype(o_ref.dtype)


def pooling_layer(x, *, kernel_size, stride=None, mode="max"):
    """Pallas equivalent of PoolingLayer(pooling_fn, kernel_size, stride) for
    NCHW input with pooling_fn in {max_pool2d, avg_pool2d} (default options)."""
    if stride is None:
        stride = kernel_size
    B, C, H, W = x.shape
    out_h = (H - kernel_size) // stride + 1
    out_w = (W - kernel_size) // stride + 1

    # Layout plumbing outside the kernel: NCHW -> NHWC so the pooled axes (H, W)
    # map to leading/sublane dims and the lane axis (C) stays contiguous.
    x_nhwc = jnp.transpose(x, (0, 2, 3, 1))

    kernel = functools.partial(
        _pool2d_kernel, kernel_size=kernel_size, stride=stride,
        out_h=out_h, out_w=out_w, mode=mode)

    out_nhwc = pl.pallas_call(
        kernel,
        out_shape=jax.ShapeDtypeStruct((B, out_h, out_w, C), x.dtype),
        grid_spec=pltpu.PrefetchScalarGridSpec(
            num_scalar_prefetch=0,
            grid=(1,),  # collapse the grid: whole tensor in one invocation
            in_specs=[pl.BlockSpec((B, H, W, C), lambda i: (0, 0, 0, 0))],
            out_specs=pl.BlockSpec((B, out_h, out_w, C),
                                   lambda i: (0, 0, 0, 0)),
        ),
        compiler_params=pltpu.CompilerParams(
            dimension_semantics=("arbitrary",)),
    )(x_nhwc)

    # Back to NCHW to match the PyTorch module's output layout.
    return jnp.transpose(out_nhwc, (0, 3, 1, 2))


if __name__ == "__main__":
    B, C, H, W = 2, 4, 16, 16
    kernel_size, stride = 2, 2

    key = jax.random.PRNGKey(0)
    x = jax.random.normal(key, (B, C, H, W), dtype=jnp.float32)

    # --- max pooling (typical pooling_fn passed to PoolingLayer) ---
    y_max = jax.block_until_ready(
        pooling_layer(x, kernel_size=kernel_size, stride=stride, mode="max"))
    ref_max = jax.lax.reduce_window(
        x, -jnp.inf, jax.lax.max,
        window_dimensions=(1, 1, kernel_size, kernel_size),
        window_strides=(1, 1, stride, stride), padding="VALID")
    assert y_max.shape == (B, C, H // stride, W // stride)
    assert jnp.allclose(y_max, ref_max), "max-pool mismatch"

    # --- average pooling (the other common pooling_fn) ---
    y_avg = jax.block_until_ready(
        pooling_layer(x, kernel_size=kernel_size, stride=stride, mode="avg"))
    ref_avg = jax.lax.reduce_window(
        x, 0.0, jax.lax.add,
        window_dimensions=(1, 1, kernel_size, kernel_size),
        window_strides=(1, 1, stride, stride),
        padding="VALID") / float(kernel_size * kernel_size)
    assert jnp.allclose(y_avg, ref_avg, atol=1e-6, rtol=1e-6), "avg-pool mismatch"

    print("KERNEL_OK")
</pallas_src>

<mosaic_0001>
module attributes {stable_mosaic.version = 11 : i64} {
  func.func @_pool2d_kernel(%arg0: i32, %arg1: memref<2x16x16x4xf32, #tpu.memory_space<vmem>>, %arg2: memref<2x8x8x4xf32, #tpu.memory_space<vmem>>) attributes {dimension_semantics = [#tpu.dimension_semantics<arbitrary>], iteration_bounds = array<i64: 1>, scalar_prefetch = 0 : i64, scratch_operands = 0 : i64, tpu.core_type = #tpu.core_type<tc>, window_params = [{pipeline_mode = #tpu.pipeline_mode<synchronous>, transform_indices = @transform_0, window_bounds = array<i64: 2, 16, 16, 4>}, {pipeline_mode = #tpu.pipeline_mode<synchronous>, transform_indices = @transform_1, window_bounds = array<i64: 2, 8, 8, 4>}]} {
    %c0 = arith.constant 0 : index
    %c0_0 = arith.constant 0 : index
    %c0_1 = arith.constant 0 : index
    %c0_2 = arith.constant 0 : index
    %0 = tpu.strided_load %arg1[%c0, %c0_0, %c0_1, %c0_2] {strides = array<i32: 1, 2, 2, 1>} : memref<2x16x16x4xf32, #tpu.memory_space<vmem>>, vector<2x8x8x4xf32>
    %c0_3 = arith.constant 0 : index
    %c0_4 = arith.constant 0 : index
    %c1 = arith.constant 1 : index
    %c0_5 = arith.constant 0 : index
    %1 = tpu.strided_load %arg1[%c0_3, %c0_4, %c1, %c0_5] {strides = array<i32: 1, 2, 2, 1>} : memref<2x16x16x4xf32, #tpu.memory_space<vmem>>, vector<2x8x8x4xf32>
    %2 = arith.maximumf %0, %1 : vector<2x8x8x4xf32>
    %c0_6 = arith.constant 0 : index
    %c1_7 = arith.constant 1 : index
    %c0_8 = arith.constant 0 : index
    %c0_9 = arith.constant 0 : index
    %3 = tpu.strided_load %arg1[%c0_6, %c1_7, %c0_8, %c0_9] {strides = array<i32: 1, 2, 2, 1>} : memref<2x16x16x4xf32, #tpu.memory_space<vmem>>, vector<2x8x8x4xf32>
    %4 = arith.maximumf %2, %3 : vector<2x8x8x4xf32>
    %c0_10 = arith.constant 0 : index
    %c1_11 = arith.constant 1 : index
    %c1_12 = arith.constant 1 : index
    %c0_13 = arith.constant 0 : index
    %5 = tpu.strided_load %arg1[%c0_10, %c1_11, %c1_12, %c0_13] {strides = array<i32: 1, 2, 2, 1>} : memref<2x16x16x4xf32, #tpu.memory_space<vmem>>, vector<2x8x8x4xf32>
    %6 = arith.maximumf %4, %5 : vector<2x8x8x4xf32>
    %c0_14 = arith.constant 0 : index
    %c0_15 = arith.constant 0 : index
    %c0_16 = arith.constant 0 : index
    %c0_17 = arith.constant 0 : index
    %7 = vector.load %arg2[%c0_14, %c0_15, %c0_16, %c0_17] : memref<2x8x8x4xf32, #tpu.memory_space<vmem>>, vector<2x8x8x4xf32>
    tpu.vector_store %arg2[%c0_14, %c0_15, %c0_16, %c0_17], %6 {strides = array<i32>} : memref<2x8x8x4xf32, #tpu.memory_space<vmem>>, vector<2x8x8x4xf32>,
    return
  }
  func.func @transform_0(%arg0: i32) -> (i32, i32, i32, i32) {
    %c0_i32 = arith.constant 0 : i32
    %c0_i32_0 = arith.constant 0 : i32
    %c0_i32_1 = arith.constant 0 : i32
    %c0_i32_2 = arith.constant 0 : i32
    %c0_i32_3 = arith.constant 0 : i32
    return %c0_i32, %c0_i32_0, %c0_i32_1, %c0_i32_2 : i32, i32, i32, i32
  }
  func.func @transform_1(%arg0: i32) -> (i32, i32, i32, i32) {
    %c0_i32 = arith.constant 0 : i32
    %c0_i32_0 = arith.constant 0 : i32
    %c0_i32_1 = arith.constant 0 : i32
    %c0_i32_2 = arith.constant 0 : i32
    %c0_i32_3 = arith.constant 0 : i32
    return %c0_i32, %c0_i32_0, %c0_i32_1, %c0_i32_2 : i32, i32, i32, i32
  }
}

</mosaic_0001>

<bundles_post_ra>
// kernel: tpu_custom_call.1
= control target key start
LH: loop header
LB: loop body
LE: loop exit
PB: predicated region body
PF: predicated region fallthrough
CT: control target
= control target key end

     0   :  { %vm183_vm0 = vcmask 31744   ;;  %s564_s0 = inlined_call_operand.vmem [shape: f32[2,16,16,4], index: 0, kind: input, shape index: {}]   ;;  %s565_s1 = inlined_call_operand.vmem [shape: f32[2,8,8,4], index: 1, kind: output, shape index: {}]  }
   0x1   :  { %v8_v0 = vld [vmem:[%s564_s0] ss:$2 sm:$0xff]  ;;  %v250_v1 = vld [vmem:[%s564_s0 + $0x1] ss:$2 sm:$0xff]  ;;  %v266_v2 = vld [vmem:[%s564_s0 + $0x10] ss:$2 sm:$0xff] }
   0x2   :  { %v71_v3 = vmax.f32 %v8_v0, %v250_v1  ;;  %v282_v4 = vld [vmem:[%s564_s0 + $0x11] ss:$2 sm:$0xff]  ;;  %v235_v5 = vld [vmem:[%s564_s0 + $0x20] ss:$2 sm:$0xff]  ;;  %v251_v6 = vld [vmem:[%s564_s0 + $0x21] ss:$2 sm:$0xff] }
   0x3   :  { %v72_v7 = vmax.f32 %v235_v5, %v251_v6  ;;  %v267_v8 = vld [vmem:[%s564_s0 + $0x30] ss:$2 sm:$0xff]  ;;  %v283_v9 = vld [vmem:[%s564_s0 + $0x31] ss:$2 sm:$0xff]  ;;  %v236_v10 = vld [vmem:[%s564_s0 + $0x40] ss:$2 sm:$0xff] }
   0x4   :  { %v119_v11 = vmax.f32 %v71_v3, %v266_v2  ;;  %v252_v12 = vld [vmem:[%s564_s0 + $0x41] ss:$2 sm:$0xff]  ;;  %v268_v13 = vld [vmem:[%s564_s0 + $0x50] ss:$2 sm:$0xff]  ;;  %v284_v14 = vld [vmem:[%s564_s0 + $0x51] ss:$2 sm:$0xff] }
   0x5   :  { %v120_v15 = vmax.f32 %v72_v7, %v267_v8  ;;  %v73_v16 = vmax.f32 %v236_v10, %v252_v12  ;;  %v237_v17 = vld [vmem:[%s564_s0 + $0x60] ss:$2 sm:$0xff]  ;;  %v253_v18 = vld [vmem:[%s564_s0 + $0x61] ss:$2 sm:$0xff]  ;;  %v269_v19 = vld [vmem:[%s564_s0 + $0x70] ss:$2 sm:$0xff] }
   0x6   :  { %v167_v20 = vmax.f32 %v119_v11, %v282_v4  ;;  %v74_v21 = vmax.f32 %v237_v17, %v253_v18  ;;  %v285_v22 = vld [vmem:[%s564_s0 + $0x71] ss:$2 sm:$0xff]  ;;  %v238_v23 = vld [vmem:[%s564_s0 + $0x80] ss:$2 sm:$0xff]  ;;  %v254_v24 = vld [vmem:[%s564_s0 + $0x81] ss:$2 sm:$0xff] }
   0x7   :  { %v168_v25 = vmax.f32 %v120_v15, %v283_v9  ;;  %v121_v26 = vmax.f32 %v73_v16, %v268_v13  ;;  %v75_v27 = vmax.f32 %v238_v23, %v254_v24  ;;  %v270_v28 = vld [vmem:[%s564_s0 + $0x90] ss:$2 sm:$0xff]  ;;  %v286_v29 = vld [vmem:[%s564_s0 + $0x91] ss:$2 sm:$0xff]  ;;  %v239_v30 = vld [vmem:[%s564_s0 + $0xa0] ss:$2 sm:$0xff] }
   0x8   :  { %184 = vst.msk [vmem:[%s565_s1] sm:$0xff] %vm183_vm0, %v167_v20  ;;  %v122_v31 = vmax.f32 %v74_v21, %v269_v19  ;;  %v255_v32 = vld [vmem:[%s564_s0 + $0xa1] ss:$2 sm:$0xff]  ;;  %v271_v33 = vld [vmem:[%s564_s0 + $0xb0] ss:$2 sm:$0xff] }
   0x9   :  { %185 = vst.msk [vmem:[%s565_s1 + $0x8] sm:$0xff] %vm183_vm0, %v168_v25  ;;  %v169_v34 = vmax.f32 %v121_v26, %v284_v14  ;;  %v123_v35 = vmax.f32 %v75_v27, %v270_v28  ;;  %v76_v36 = vmax.f32 %v239_v30, %v255_v32  ;;  %v287_v37 = vld [vmem:[%s564_s0 + $0xb1] ss:$2 sm:$0xff]  ;;  %v240_v38 = vld [vmem:[%s564_s0 + $0xc0] ss:$2 sm:$0xff] }
   0xa   :  { %v170_v39 = vmax.f32 %v122_v31, %v285_v22  ;;  %v256_v40 = vld [vmem:[%s564_s0 + $0xc1] ss:$2 sm:$0xff]  ;;  %v272_v41 = vld [vmem:[%s564_s0 + $0xd0] ss:$2 sm:$0xff]  ;;  %v288_v42 = vld [vmem:[%s564_s0 + $0xd1] ss:$2 sm:$0xff] }
   0xb   :  { %186 = vst.msk [vmem:[%s565_s1 + $0x10] sm:$0xff] %vm183_vm0, %v169_v34  ;;  %v171_v43 = vmax.f32 %v123_v35, %v286_v29  ;;  %v124_v44 = vmax.f32 %v76_v36, %v271_v33  ;;  %v77_v45 = vmax.f32 %v240_v38, %v256_v40  ;;  %v241_v46 = vld [vmem:[%s564_s0 + $0xe0] ss:$2 sm:$0xff]  ;;  %v257_v47 = vld [vmem:[%s564_s0 + $0xe1] ss:$2 sm:$0xff] }
   0xc   :  { %187 = vst.msk [vmem:[%s565_s1 + $0x18] sm:$0xff] %vm183_vm0, %v170_v39  ;;  %v78_v48 = vmax.f32 %v241_v46, %v257_v47  ;;  %v273_v49 = vld [vmem:[%s564_s0 + $0xf0] ss:$2 sm:$0xff]  ;;  %v289_v50 = vld [vmem:[%s564_s0 + $0xf1] ss:$2 sm:$0xff] }
   0xd   :  { %188 = vst.msk [vmem:[%s565_s1 + $0x20] sm:$0xff] %vm183_vm0, %v171_v43  ;;  %v172_v51 = vmax.f32 %v124_v44, %v287_v37  ;;  %v125_v52 = vmax.f32 %v77_v45, %v272_v41  ;;  %v242_v53 = vld [vmem:[%s564_s0 + $0x100] ss:$2 sm:$0xff]  ;;  %v258_v54 = vld [vmem:[%s564_s0 + $0x101] ss:$2 sm:$0xff] }
   0xe   :  { %v126_v55 = vmax.f32 %v78_v48, %v273_v49  ;;  %v79_v56 = vmax.f32 %v242_v53, %v258_v54  ;;  %v274_v57 = vld [vmem:[%s564_s0 + $0x110] ss:$2 sm:$0xff]  ;;  %v290_v58 = vld [vmem:[%s564_s0 + $0x111] ss:$2 sm:$0xff]  ;;  %v243_v59 = vld [vmem:[%s564_s0 + $0x120] ss:$2 sm:$0xff] }
   0xf   :  { %189 = vst.msk [vmem:[%s565_s1 + $0x28] sm:$0xff] %vm183_vm0, %v172_v51  ;;  %v173_v60 = vmax.f32 %v125_v52, %v288_v42  ;;  %v259_v61 = vld [vmem:[%s564_s0 + $0x121] ss:$2 sm:$0xff]  ;;  %v275_v62 = vld [vmem:[%s564_s0 + $0x130] ss:$2 sm:$0xff] }
  0x10   :  { %v174_v63 = vmax.f32 %v126_v55, %v289_v50  ;;  %v127_v0 = vmax.f32 %v79_v56, %v274_v57  ;;  %v80_v1 = vmax.f32 %v243_v59, %v259_v61  ;;  %v291_v2 = vld [vmem:[%s564_s0 + $0x131] ss:$2 sm:$0xff]  ;;  %v244_v3 = vld [vmem:[%s564_s0 + $0x140] ss:$2 sm:$0xff]  ;;  %v260_v4 = vld [vmem:[%s564_s0 + $0x141] ss:$2 sm:$0xff] }
  0x11   :  { %190 = vst.msk [vmem:[%s565_s1 + $0x30] sm:$0xff] %vm183_vm0, %v173_v60  ;;  %v81_v5 = vmax.f32 %v244_v3, %v260_v4  ;;  %v276_v6 = vld [vmem:[%s564_s0 + $0x150] ss:$2 sm:$0xff]  ;;  %v292_v7 = vld [vmem:[%s564_s0 + $0x151] ss:$2 sm:$0xff] }
  0x12   :  { %191 = vst.msk [vmem:[%s565_s1 + $0x38] sm:$0xff] %vm183_vm0, %v174_v63  ;;  %v175_v8 = vmax.f32 %v127_v0, %v290_v58  ;;  %v128_v9 = vmax.f32 %v80_v1, %v275_v62  ;;  %v245_v10 = vld [vmem:[%s564_s0 + $0x160] ss:$2 sm:$0xff]  ;;  %v261_v11 = vld [vmem:[%s564_s0 + $0x161] ss:$2 sm:$0xff] }
  0x13   :  { %v129_v12 = vmax.f32 %v81_v5, %v276_v6  ;;  %v82_v13 = vmax.f32 %v245_v10, %v261_v11  ;;  %v277_v14 = vld [vmem:[%s564_s0 + $0x170] ss:$2 sm:$0xff]  ;;  %v293_v15 = vld [vmem:[%s564_s0 + $0x171] ss:$2 sm:$0xff]  ;;  %v246_v16 = vld [vmem:[%s564_s0 + $0x180] ss:$2 sm:$0xff] }
  0x14   :  { %192 = vst.msk [vmem:[%s565_s1 + $0x40] sm:$0xff] %vm183_vm0, %v175_v8  ;;  %v176_v17 = vmax.f32 %v128_v9, %v291_v2  ;;  %v262_v18 = vld [vmem:[%s564_s0 + $0x181] ss:$2 sm:$0xff]  ;;  %v278_v19 = vld [vmem:[%s564_s0 + $0x190] ss:$2 sm:$0xff] }
  0x15   :  { %v177_v20 = vmax.f32 %v129_v12, %v292_v7  ;;  %v130_v21 = vmax.f32 %v82_v13, %v277_v14  ;;  %v83_v22 = vmax.f32 %v246_v16, %v262_v18  ;;  %v294_v23 = vld [vmem:[%s564_s0 + $0x191] ss:$2 sm:$0xff]  ;;  %v247_v24 = vld [vmem:[%s564_s0 + $0x1a0] ss:$2 sm:$0xff]  ;;  %v263_v25 = vld [vmem:[%s564_s0 + $0x1a1] ss:$2 sm:$0xff] }
  0x16   :  { %193 = vst.msk [vmem:[%s565_s1 + $0x48] sm:$0xff] %vm183_vm0, %v176_v17  ;;  %v84_v26 = vmax.f32 %v247_v24, %v263_v25  ;;  %v279_v27 = vld [vmem:[%s564_s0 + $0x1b0] ss:$2 sm:$0xff]  ;;  %v295_v28 = vld [vmem:[%s564_s0 + $0x1b1] ss:$2 sm:$0xff] }
  0x17   :  { %194 = vst.msk [vmem:[%s565_s1 + $0x50] sm:$0xff] %vm183_vm0, %v177_v20  ;;  %v178_v29 = vmax.f32 %v130_v21, %v293_v15  ;;  %v131_v30 = vmax.f32 %v83_v22, %v278_v19  ;;  %v248_v31 = vld [vmem:[%s564_s0 + $0x1c0] ss:$2 sm:$0xff]  ;;  %v264_v32 = vld [vmem:[%s564_s0 + $0x1c1] ss:$2 sm:$0xff] }
  0x18   :  { %v132_v33 = vmax.f32 %v84_v26, %v279_v27  ;;  %v85_v34 = vmax.f32 %v248_v31, %v264_v32  ;;  %v280_v35 = vld [vmem:[%s564_s0 + $0x1d0] ss:$2 sm:$0xff]  ;;  %v296_v36 = vld [vmem:[%s564_s0 + $0x1d1] ss:$2 sm:$0xff]  ;;  %v249_v37 = vld [vmem:[%s564_s0 + $0x1e0] ss:$2 sm:$0xff] }
  0x19   :  { %195 = vst.msk [vmem:[%s565_s1 + $0x58] sm:$0xff] %vm183_vm0, %v178_v29  ;;  %v179_v38 = vmax.f32 %v131_v30, %v294_v23  ;;  %v265_v39 = vld [vmem:[%s564_s0 + $0x1e1] ss:$2 sm:$0xff]  ;;  %v281_v40 = vld [vmem:[%s564_s0 + $0x1f0] ss:$2 sm:$0xff] }
  0x1a   :  { %v180_v41 = vmax.f32 %v132_v33, %v295_v28  ;;  %v133_v42 = vmax.f32 %v85_v34, %v280_v35  ;;  %v86_v43 = vmax.f32 %v249_v37, %v265_v39  ;;  %v297_v44 = vld [vmem:[%s564_s0 + $0x1f1] ss:$2 sm:$0xff] }
  0x1b   :  { %196 = vst.msk [vmem:[%s565_s1 + $0x60] sm:$0xff] %vm183_vm0, %v179_v38 }
  0x1c   :  { %197 = vst.msk [vmem:[%s565_s1 + $0x68] sm:$0xff] %vm183_vm0, %v180_v41  ;;  %v181_v45 = vmax.f32 %v133_v42, %v296_v36  ;;  %v134_v46 = vmax.f32 %v86_v43, %v281_v40 }
  0x1e   :  { %198 = vst.msk [vmem:[%s565_s1 + $0x70] sm:$0xff] %vm183_vm0, %v181_v45  ;;  %v182_v47 = vmax.f32 %v134_v46, %v297_v44 }
  0x20   :  { %199 = vst.msk [vmem:[%s565_s1 + $0x78] sm:$0xff] %vm183_vm0, %v182_v47 }

</bundles_post_ra>
